<compile_context>
chip_gen: v7x
topology: tpu7x:2x2x1
jax: 0.10.0
libtpu: 0.0.40
codegen_flags: <defaults>
</compile_context>

<pallas_src>
import jax
import jax.numpy as jnp
from jax.experimental import pallas as pl
from jax.experimental.pallas import tpu as pltpu


_LANE = 128
_SUBLANE = 8
# ~2 MiB per VMEM buffer. 2 arrays (in+out) x 2 pipeline buffers = ~8 MiB.
_TARGET_BLOCK_BYTES = 2 * 1024 * 1024


def _make_round_kernel(bins: float, inv_bins: float):
    def kernel(x_ref, o_ref):
        x = x_ref[...].astype(jnp.float32)
        # bins is a power of two, so `* inv_bins` is bit-identical to `/ bins`.
        o_ref[...] = (jnp.round(x * bins) * inv_bins).astype(o_ref.dtype)
    return kernel


def round_quantize(x: jax.Array, nbits: int | None = None) -> jax.Array:
    """Pallas implementation of Round.forward(x, nbits) (float inputs)."""
    n_bit = nbits if nbits is not None else 8
    bins = float(2 ** n_bit)
    inv_bins = float(2.0 ** (-n_bit))

    orig_shape = x.shape
    orig_dtype = x.dtype
    total = x.size
    if total == 0:
        return x
    # TODO(synk): integer dtypes would silently truncate on the final cast;
    # this kernel (like the PyTorch module) is intended for float inputs.

    # --- choose a lane-dense 2-D slab [rows, width] ---------------------------
    # Prefer a wide lane dim that divides `total` exactly so the wrapper does
    # NO pad/slice HBM round trips (reshape of a contiguous array is free).
    width = None
    for cand in (2048, 1024, 512, 256, 128):
        if total % cand == 0:
            width = cand
            break

    x_flat = jnp.reshape(x, (-1,))
    if width is None:
        # ragged fallback: pad the flat vector up to a multiple of 128 lanes
        width = _LANE
        rows = pl.cdiv(total, width)
        x_flat = jnp.pad(x_flat, (0, rows * width - total))
        needs_slice = True
    else:
        rows = total // width
        needs_slice = False

    x2d = jnp.reshape(x_flat, (rows, width))

    # --- pick block size (~_TARGET_BLOCK_BYTES per buffer) --------------------
    itemsize = jnp.dtype(orig_dtype).itemsize
    target_rows = max(
        _SUBLANE,
        (_TARGET_BLOCK_BYTES // (width * itemsize)) // _SUBLANE * _SUBLANE,
    )
    if rows <= target_rows:
        block_rows = rows        # single block along rows: full-dim block is always legal
    else:
        block_rows = target_rows  # multiple of 8; ragged tail handled by cdiv grid

    num_blocks = pl.cdiv(rows, block_rows)

    out2d = pl.pallas_call(
        _make_round_kernel(bins, inv_bins),
        out_shape=jax.ShapeDtypeStruct((rows, width), orig_dtype),
        grid=(num_blocks,),
        in_specs=[pl.BlockSpec((block_rows, width), lambda i: (i, 0))],
        out_specs=pl.BlockSpec((block_rows, width), lambda i: (i, 0)),
        compiler_params=pltpu.CompilerParams(
            dimension_semantics=("parallel",)),
    )(x2d)

    out_flat = jnp.reshape(out2d, (-1,))
    if needs_slice:
        out_flat = out_flat[:total]
    return jnp.reshape(out_flat, orig_shape)


if __name__ == "__main__":
    key = jax.random.PRNGKey(0)
    # NCHW input, small shape
    x = jax.random.normal(key, (2, 4, 16, 16), dtype=jnp.float32)

    out = round_quantize(x, nbits=None)      # defaults to 8 bits
    jax.block_until_ready(out)

    # reference check in plain JAX (same semantics as the torch.round path)
    bins = 2.0 ** 8
    ref = jnp.round(x * bins) / bins
    assert out.shape == x.shape and out.dtype == x.dtype
    assert jnp.allclose(out, ref), "mismatch vs reference"

    print("KERNEL_OK")
</pallas_src>

<mosaic_0001>
module attributes {stable_mosaic.version = 11 : i64} {
  func.func @kernel(%arg0: i32, %arg1: memref<1x2048xf32, #tpu.memory_space<vmem>>, %arg2: memref<1x2048xf32, #tpu.memory_space<vmem>>) attributes {dimension_semantics = [#tpu.dimension_semantics<parallel>], iteration_bounds = array<i64: 1>, scalar_prefetch = 0 : i64, scratch_operands = 0 : i64, tpu.core_type = #tpu.core_type<tc>, window_params = [{transform_indices = @transform_0, window_bounds = array<i64: 1, 2048>}, {transform_indices = @transform_1, window_bounds = array<i64: 1, 2048>}]} {
    %c0 = arith.constant 0 : index
    %c0_0 = arith.constant 0 : index
    %0 = vector.load %arg1[%c0, %c0_0] : memref<1x2048xf32, #tpu.memory_space<vmem>>, vector<1x2048xf32>
    %cst = arith.constant 2.560000e+02 : f32
    %1 = vector.broadcast %cst : f32 to vector<1x2048xf32>
    %2 = arith.mulf %0, %1 : vector<1x2048xf32>
    %3 = math.roundeven %2 : vector<1x2048xf32>
    %cst_1 = arith.constant 3.906250e-03 : f32
    %4 = vector.broadcast %cst_1 : f32 to vector<1x2048xf32>
    %5 = arith.mulf %3, %4 : vector<1x2048xf32>
    %c0_2 = arith.constant 0 : index
    %c0_3 = arith.constant 0 : index
    %6 = vector.load %arg2[%c0_2, %c0_3] : memref<1x2048xf32, #tpu.memory_space<vmem>>, vector<1x2048xf32>
    tpu.vector_store %arg2[%c0_2, %c0_3], %5 {strides = array<i32>} : memref<1x2048xf32, #tpu.memory_space<vmem>>, vector<1x2048xf32>,
    return
  }
  func.func @transform_0(%arg0: i32) -> (i32, i32) {
    %c0_i32 = arith.constant 0 : i32
    %c0_i32_0 = arith.constant 0 : i32
    return %arg0, %c0_i32 : i32, i32
  }
  func.func @transform_1(%arg0: i32) -> (i32, i32) {
    %c0_i32 = arith.constant 0 : i32
    %c0_i32_0 = arith.constant 0 : i32
    return %arg0, %c0_i32 : i32, i32
  }
}

</mosaic_0001>

<bundles_post_ra>
// kernel: tpu_custom_call.1
= control target key start
LH: loop header
LB: loop body
LE: loop exit
PB: predicated region body
PF: predicated region fallthrough
CT: control target
= control target key end

     0   :  { %6 = vsyncpa [#allocation3], 0  ;;  %s134_s0 = inlined_call_operand.hbm [shape: f32[1,2048], index: 0, kind: input, shape index: {}]   ;;  %s135_s1 = inlined_call_operand.hbm [shape: f32[1,2048], index: 1, kind: output, shape index: {}]  }
   0x1   :  { %7 = vsyncpa [#allocation4], 0  ;;  %s98_s6 = smov [#allocation2]   ;;  %s50_s10 = scalar_lea.hbm %s134_s0, 256 }
   0x2   :  { %s14_s7 = sshll.u32 %s98_s6, 4  ;;  %p51_p0 = scmp.ne.s32.totalorder %s134_s0, %s50_s10  ;;  %s15_s7 = int_to_ptr.vmem [resolvable:$true] %s14_s7 }
   0x3   :  { %p54_p1 = scmp.lt.u32.totalorder %s50_s10, %s134_s0 }
   0x5   :  { %p56_p2 = pnand %p54_p1, %p51_p0 }
   0x7   :  { %59 = shalt.err (!%p56_p2)
}
   0x8   :  { %s60_s15 = scalar_lea.vmem %s15_s7, 256  ;;  %p65_p4 = scmp.lt.s32.totalorder %s15_s7, %s15_s7 }
   0x9   :  { %p61_p3 = scmp.ne.s32.totalorder %s15_s7, %s60_s15  ;;  %p66_p5 = scmp.lt.s32.totalorder %s60_s15, %s60_s15 }
   0xb   :  { %p67_p6 = por %p66_p5, %p65_p4 }
   0xd   :  { %p68_p7 = pnand %p67_p6, %p61_p3 }
   0xf   :  { %71 = shalt.err (!%p68_p7)
}
  0x10   :  { %17 = dma.hbm_to_vmem [thread:$0]  %s134_s0, 256, %s15_s7, [#allocation3]  }
  0x11   :  { %94 = dma.done.wait [#allocation3], 256  }
  0x12   :  { %95 = vsyncadd [#allocation3], 4294967040  ;;  %v21_v0 = vld [vmem:[#allocation2] sm:$0xff]  ;;  %v22_v1 = vld [vmem:[#allocation2 + $0x8] sm:$0xff]  ;;  %s99_s18 = smov [#allocation5]  }
  0x13   :  { %v23_v2 = vmul.f32 256.0, %v21_v0  ;;  %v24_v3 = vmul.f32 256.0, %v22_v1  ;;  %s37_s19 = sshll.u32 %s99_s18, 4  ;;  %s38_s19 = int_to_ptr.vmem [resolvable:$true] %s37_s19 }
  0x14   :  { %s72_s20 = scalar_lea.vmem %s38_s19, 256  ;;  %p77_p9 = scmp.lt.s32.totalorder %s38_s19, %s38_s19 }
  0x15   :  { %v46_v4 = vround.rtne.f32 %v23_v2  ;;  %v47_v5 = vround.rtne.f32 %v24_v3  ;;  %p73_p8 = scmp.ne.s32.totalorder %s38_s19, %s72_s20  ;;  %p78_p10 = scmp.lt.s32.totalorder %s72_s20, %s72_s20 }
  0x17   :  { %v27_v6 = vmul.f32 0.00390625, %v46_v4  ;;  %v28_v7 = vmul.f32 0.00390625, %v47_v5  ;;  %p79_p11 = por %p78_p10, %p77_p9 }
  0x19   :  { %29 = vst [vmem:[#allocation5] sm:$0xff] %v27_v6  ;;  %30 = vst [vmem:[#allocation5 + $0x8] sm:$0xff] %v28_v7  ;;  %p80_p12 = pnand %p79_p11, %p73_p8 }
  0x1b   :  { %83 = shalt.err (!%p80_p12)
}
  0x1c   :  { %s84_s22 = scalar_lea.hbm %s135_s1, 256 }
  0x1d   :  { %p85_p13 = scmp.ne.s32.totalorder %s135_s1, %s84_s22  ;;  %p88_p0 = scmp.lt.u32.totalorder %s84_s22, %s135_s1 }
  0x1f   :  { %p90_p1 = pnand %p88_p0, %p85_p13 }
  0x21   :  { %93 = shalt.err (!%p90_p1)
}
  0x22   :  { %40 = dma.vmem_to_hbm [thread:$0]  %s38_s19, 256, %s135_s1, [#allocation4]  }
  0x23   :  { %96 = dma.done.wait [#allocation4], 256  }
  0x24   :  { %97 = vsyncadd [#allocation4], 4294967040 }
  0x25   :  { %44 = vsyncpa [#allocation3], 1 }
  0x26   :  { %45 = vsyncpa [#allocation4], 1 }

</bundles_post_ra>
